<compile_context>
chip_gen: v5e
topology: v5e:2x2
jax: 0.10.0
libtpu: 0.0.40
codegen_flags: <defaults>
</compile_context>

<pallas_src>
import jax
import jax.numpy as jnp
from jax.experimental import pallas as pl
from jax.experimental.pallas import tpu as pltpu

EPS = 1e-5          # torch.nn.BatchNorm1d default eps
NEG_SLOPE = 0.01    # torch.nn.LeakyReLU default negative_slope


def _round_up(v, m):
    return ((v + m - 1) // m) * m


def linear_block_kernel(x_ref, w_ref, gamma_ref, beta_ref, o_ref):
    # x_ref: (N, TK)  w_ref: (TK, TN)  gamma/beta: (1, TN)  o_ref: (N, TN)
    # o_ref doubles as the f32 accumulator: its block index is constant across
    # the IN (reduction) grid axis, so it stays resident in VMEM.
    k = pl.program_id(1)

    @pl.when(k == 0)
    def _init():
        o_ref[...] = jnp.zeros_like(o_ref)

    # MXU matmul in (M,K)x(K,N) form, f32 accumulate directly into the output tile.
    o_ref[...] += jnp.dot(x_ref[...], w_ref[...],
                          preferred_element_type=jnp.float32)

    @pl.when(k == pl.num_programs(1) - 1)
    def _finalize():
        z = o_ref[...]
        inv_n = 1.0 / z.shape[0]
        # BatchNorm1d, training mode: batch statistics, biased variance (stable,
        # centered form).  Stats are per-feature -> local to this OUT tile.
        mean = jnp.sum(z, axis=0, keepdims=True) * inv_n
        centered = z - mean
        var = jnp.sum(centered * centered, axis=0, keepdims=True) * inv_n
        # Folded affine: y = centered * (gamma * rsqrt(var + eps)) + beta
        scale = gamma_ref[...] * jax.lax.rsqrt(var + EPS)
        y = centered * scale + beta_ref[...]
        # LeakyReLU
        o_ref[...] = jnp.where(y >= 0, y, NEG_SLOPE * y).astype(o_ref.dtype)


def linear_block_forward(x, w, b, gamma, beta):
    # `b` is intentionally unused: BN mean subtraction cancels it exactly.
    del b
    N, IN = x.shape
    OUT = w.shape[0]

    IN_pad = _round_up(IN, 128)
    OUT_pad = _round_up(OUT, 128)
    # Tile sizes: MXU-friendly, lane-dense, and guaranteed to divide the padded dims.
    TK = 512 if IN_pad % 512 == 0 else (256 if IN_pad % 256 == 0 else 128)
    TN = 256 if OUT_pad % 256 == 0 else 128

    # One-time XLA-side layout prep: transpose W to (IN, OUT) and zero-pad.
    xp = jnp.pad(x.astype(jnp.float32), ((0, 0), (0, IN_pad - IN)))
    wt = jnp.pad(w.astype(jnp.float32).T, ((0, IN_pad - IN), (0, OUT_pad - OUT)))
    g2 = jnp.pad(gamma.astype(jnp.float32).reshape(1, OUT),
                 ((0, 0), (0, OUT_pad - OUT)))
    bt2 = jnp.pad(beta.astype(jnp.float32).reshape(1, OUT),
                  ((0, 0), (0, OUT_pad - OUT)))

    grid = (OUT_pad // TN, IN_pad // TK)  # (OUT tiles [parallel], IN tiles [arbitrary])

    out_pad = pl.pallas_call(
        linear_block_kernel,
        out_shape=jax.ShapeDtypeStruct((N, OUT_pad), jnp.float32),
        grid_spec=pltpu.PrefetchScalarGridSpec(
            num_scalar_prefetch=0,
            grid=grid,
            in_specs=[
                pl.BlockSpec((N, TK), lambda j, k: (0, k)),   # x tile
                pl.BlockSpec((TK, TN), lambda j, k: (k, j)),  # W^T tile
                pl.BlockSpec((1, TN), lambda j, k: (0, j)),   # gamma tile
                pl.BlockSpec((1, TN), lambda j, k: (0, j)),   # beta tile
            ],
            out_specs=pl.BlockSpec((N, TN), lambda j, k: (0, j)),
        ),
        compiler_params=pltpu.CompilerParams(
            dimension_semantics=("parallel", "arbitrary"),
            vmem_limit_bytes=64 * 1024 * 1024,
        ),
        cost_estimate=pl.CostEstimate(
            flops=2 * N * IN_pad * OUT_pad,
            transcendentals=OUT_pad,
            bytes_accessed=4 * (N * IN_pad + IN_pad * OUT_pad + N * OUT_pad),
        ),
    )(xp, wt, g2, bt2)

    return out_pad[:, :OUT]


if __name__ == "__main__":
    key = jax.random.PRNGKey(0)
    k_x, k_w, k_b = jax.random.split(key, 3)

    N, IN, OUT = 8, 32, 16  # small shapes; LazyLinear infers IN from the input

    x = jax.random.normal(k_x, (N, IN), dtype=jnp.float32)

    # Deterministic parameter init mimicking torch defaults (uniform bounds).
    bound = 1.0 / jnp.sqrt(IN)
    w = jax.random.uniform(k_w, (OUT, IN), minval=-bound, maxval=bound,
                           dtype=jnp.float32)
    b = jax.random.uniform(k_b, (OUT,), minval=-bound, maxval=bound,
                           dtype=jnp.float32)
    gamma = jnp.ones((OUT,), dtype=jnp.float32)   # BatchNorm1d affine weight init
    beta = jnp.zeros((OUT,), dtype=jnp.float32)   # BatchNorm1d affine bias init

    out = linear_block_forward(x, w, b, gamma, beta)
    jax.block_until_ready(out)

    # Pure-JAX reference of the full PyTorch math (bias included: it cancels in BN).
    z_ref = x @ w.T + b
    mean = z_ref.mean(0, keepdims=True)
    var = ((z_ref - mean) ** 2).mean(0, keepdims=True)
    y_ref = (z_ref - mean) / jnp.sqrt(var + EPS) * gamma + beta
    ref = jnp.where(y_ref >= 0, y_ref, NEG_SLOPE * y_ref)
    assert jnp.allclose(out, ref, atol=1e-4, rtol=1e-4), "mismatch vs reference"

    print("KERNEL_OK")
</pallas_src>

<mosaic_0001>
module attributes {stable_mosaic.version = 11 : i64} {
  func.func @linear_block_kernel(%arg0: i32, %arg1: i32, %arg2: memref<8x128xf32, #tpu.memory_space<vmem>>, %arg3: memref<128x128xf32, #tpu.memory_space<vmem>>, %arg4: memref<1x128xf32, #tpu.memory_space<vmem>>, %arg5: memref<1x128xf32, #tpu.memory_space<vmem>>, %arg6: memref<8x128xf32, #tpu.memory_space<vmem>>) attributes {dimension_semantics = [#tpu.dimension_semantics<parallel>, #tpu.dimension_semantics<arbitrary>], iteration_bounds = array<i64: 1, 1>, scalar_prefetch = 0 : i64, scratch_operands = 0 : i64, tpu.core_type = #tpu.core_type<tc>, window_params = [{transform_indices = @transform_0, window_bounds = array<i64: 8, 128>}, {transform_indices = @transform_1, window_bounds = array<i64: 128, 128>}, {transform_indices = @transform_2, window_bounds = array<i64: 1, 128>}, {transform_indices = @transform_3, window_bounds = array<i64: 1, 128>}, {transform_indices = @transform_4, window_bounds = array<i64: 8, 128>}]} {
    %c0_i32 = arith.constant 0 : i32
    %0 = arith.cmpi eq, %arg1, %c0_i32 : i32
    %1 = arith.extui %0 : i1 to i32
    %c0_i32_0 = arith.constant 0 : i32
    %2 = arith.cmpi ne, %1, %c0_i32_0 : i32
    scf.if %2 {
      %cst_10 = arith.constant 0.000000e+00 : f32
      %12 = vector.broadcast %cst_10 : f32 to vector<8x128xf32>
      %c0_11 = arith.constant 0 : index
      %c0_12 = arith.constant 0 : index
      %13 = vector.load %arg6[%c0_11, %c0_12] : memref<8x128xf32, #tpu.memory_space<vmem>>, vector<8x128xf32>
      tpu.vector_store %arg6[%c0_11, %c0_12], %12 {strides = array<i32>} : memref<8x128xf32, #tpu.memory_space<vmem>>, vector<8x128xf32>,
    } else {
    }
    %c0 = arith.constant 0 : index
    %c0_1 = arith.constant 0 : index
    %3 = vector.load %arg6[%c0, %c0_1] : memref<8x128xf32, #tpu.memory_space<vmem>>, vector<8x128xf32>
    %c0_2 = arith.constant 0 : index
    %c0_3 = arith.constant 0 : index
    %4 = vector.load %arg2[%c0_2, %c0_3] : memref<8x128xf32, #tpu.memory_space<vmem>>, vector<8x128xf32>
    %c0_4 = arith.constant 0 : index
    %c0_5 = arith.constant 0 : index
    %5 = vector.load %arg3[%c0_4, %c0_5] : memref<128x128xf32, #tpu.memory_space<vmem>>, vector<128x128xf32>
    %cst = arith.constant dense<0.000000e+00> : vector<8x128xf32>
    %6 = tpu.matmul %4, %5, %cst {dimension_numbers = #tpu.dot_dimension_numbers<[1], [0], [0], [1], [0, 0, 1, 1], [], []>} : vector<8x128xf32>, vector<128x128xf32>, vector<8x128xf32> -> vector<8x128xf32>
    %7 = arith.addf %3, %6 : vector<8x128xf32>
    %c0_6 = arith.constant 0 : index
    %c0_7 = arith.constant 0 : index
    %8 = vector.load %arg6[%c0_6, %c0_7] : memref<8x128xf32, #tpu.memory_space<vmem>>, vector<8x128xf32>
    tpu.vector_store %arg6[%c0_6, %c0_7], %7 {strides = array<i32>} : memref<8x128xf32, #tpu.memory_space<vmem>>, vector<8x128xf32>,
    %c0_i32_8 = arith.constant 0 : i32
    %9 = arith.cmpi eq, %arg1, %c0_i32_8 : i32
    %10 = arith.extui %9 : i1 to i32
    %c0_i32_9 = arith.constant 0 : i32
    %11 = arith.cmpi ne, %10, %c0_i32_9 : i32
    scf.if %11 {
      %c0_10 = arith.constant 0 : index
      %c0_11 = arith.constant 0 : index
      %12 = vector.load %arg6[%c0_10, %c0_11] : memref<8x128xf32, #tpu.memory_space<vmem>>, vector<8x128xf32>
      %cst_12 = arith.constant dense<0.000000e+00> : vector<128xf32>
      %13 = vector.multi_reduction <add>, %12, %cst_12 [0] : vector<8x128xf32> to vector<128xf32>
      %14 = vector.shape_cast %13 : vector<128xf32> to vector<1x128xf32>
      %cst_13 = arith.constant 1.250000e-01 : f32
      %15 = vector.broadcast %cst_13 : f32 to vector<1x128xf32>
      %16 = arith.mulf %14, %15 : vector<1x128xf32>
      %17 = vector.broadcast %16 : vector<1x128xf32> to vector<8x128xf32>
      %18 = arith.subf %12, %17 : vector<8x128xf32>
      %19 = arith.mulf %18, %18 : vector<8x128xf32>
      %cst_14 = arith.constant dense<0.000000e+00> : vector<128xf32>
      %20 = vector.multi_reduction <add>, %19, %cst_14 [0] : vector<8x128xf32> to vector<128xf32>
      %21 = vector.shape_cast %20 : vector<128xf32> to vector<1x128xf32>
      %cst_15 = arith.constant 1.250000e-01 : f32
      %22 = vector.broadcast %cst_15 : f32 to vector<1x128xf32>
      %23 = arith.mulf %21, %22 : vector<1x128xf32>
      %c0_16 = arith.constant 0 : index
      %c0_17 = arith.constant 0 : index
      %24 = vector.load %arg4[%c0_16, %c0_17] : memref<1x128xf32, #tpu.memory_space<vmem>>, vector<1x128xf32>
      %cst_18 = arith.constant 9.99999974E-6 : f32
      %25 = vector.broadcast %cst_18 : f32 to vector<1x128xf32>
      %26 = arith.addf %23, %25 : vector<1x128xf32>
      %27 = math.rsqrt %26 : vector<1x128xf32>
      %28 = arith.mulf %24, %27 : vector<1x128xf32>
      %29 = vector.broadcast %28 : vector<1x128xf32> to vector<8x128xf32>
      %30 = arith.mulf %18, %29 : vector<8x128xf32>
      %c0_19 = arith.constant 0 : index
      %c0_20 = arith.constant 0 : index
      %31 = vector.load %arg5[%c0_19, %c0_20] : memref<1x128xf32, #tpu.memory_space<vmem>>, vector<1x128xf32>
      %32 = vector.broadcast %31 : vector<1x128xf32> to vector<8x128xf32>
      %33 = arith.addf %30, %32 : vector<8x128xf32>
      %cst_21 = arith.constant 0.000000e+00 : f32
      %34 = vector.broadcast %cst_21 : f32 to vector<8x128xf32>
      %35 = arith.cmpf oge, %33, %34 : vector<8x128xf32>
      %cst_22 = arith.constant 0.00999999977 : f32
      %36 = vector.broadcast %cst_22 : f32 to vector<8x128xf32>
      %37 = arith.mulf %36, %33 : vector<8x128xf32>
      %38 = arith.select %35, %33, %37 : vector<8x128xi1>, vector<8x128xf32>
      %c0_23 = arith.constant 0 : index
      %c0_24 = arith.constant 0 : index
      %39 = vector.load %arg6[%c0_23, %c0_24] : memref<8x128xf32, #tpu.memory_space<vmem>>, vector<8x128xf32>
      tpu.vector_store %arg6[%c0_23, %c0_24], %38 {strides = array<i32>} : memref<8x128xf32, #tpu.memory_space<vmem>>, vector<8x128xf32>,
    } else {
    }
    return
  }
  func.func @transform_0(%arg0: i32, %arg1: i32) -> (i32, i32) {
    %c0_i32 = arith.constant 0 : i32
    %c0_i32_0 = arith.constant 0 : i32
    return %c0_i32, %arg1 : i32, i32
  }
  func.func @transform_1(%arg0: i32, %arg1: i32) -> (i32, i32) {
    %c0_i32 = arith.constant 0 : i32
    return %arg1, %arg0 : i32, i32
  }
  func.func @transform_2(%arg0: i32, %arg1: i32) -> (i32, i32) {
    %c0_i32 = arith.constant 0 : i32
    %c0_i32_0 = arith.constant 0 : i32
    return %c0_i32, %arg0 : i32, i32
  }
  func.func @transform_3(%arg0: i32, %arg1: i32) -> (i32, i32) {
    %c0_i32 = arith.constant 0 : i32
    %c0_i32_0 = arith.constant 0 : i32
    return %c0_i32, %arg0 : i32, i32
  }
  func.func @transform_4(%arg0: i32, %arg1: i32) -> (i32, i32) {
    %c0_i32 = arith.constant 0 : i32
    %c0_i32_0 = arith.constant 0 : i32
    return %c0_i32, %arg0 : i32, i32
  }
}

</mosaic_0001>

<bundles_post_ra>
// kernel: tpu_custom_call.1
= control target key start
LH: loop header
LB: loop body
LE: loop exit
PB: predicated region body
PF: predicated region fallthrough
CT: control target
= control target key end

     0   :  { %9 = vsyncpa [#allocation3], 0  ;;  %s289_s0 = inlined_call_operand.hbm [shape: f32[8,128], index: 0, kind: input, shape index: {}]   ;;  %s290_s1 = inlined_call_operand.hbm [shape: f32[128,128], index: 1, kind: input, shape index: {}]   ;;  %s291_s2 = inlined_call_operand.vmem [shape: f32[1,128], index: 2, kind: input, shape index: {}]   ;;  %s292_s3 = inlined_call_operand.vmem [shape: f32[1,128], index: 3, kind: input, shape index: {}]   ;;  %s293_s4 = inlined_call_operand.hbm [shape: f32[8,128], index: 4, kind: output, shape index: {}]  }
   0x1   :  { %10 = vsyncpa [#allocation6], 0 }
   0x2   :  { %11 = vsyncpa [#allocation4], 0  ;;  %s17_s17 = sshll.u32 %s289_s0, 4  ;;  %s244_s18 = smov [#allocation2]   ;;  %s18_s17 = int_to_ptr.hbm [resolvable:$true] %s17_s17 }
   0x3   :  { %s19_s19 = sshll.u32 %s244_s18, 4  ;;  %s27_s22 = sshll.u32 %s290_s1, 4  ;;  %s20_s19 = int_to_ptr.vmem [resolvable:$true] %s19_s19  ;;  %s28_s22 = int_to_ptr.hbm [resolvable:$true] %s27_s22 }
   0x4   :  { %22 = dma.hbm_to_vmem [thread:$0]  %s18_s17, 128, %s20_s19, [#allocation3]  }
   0x5   :  { %s245_s23 = smov [#allocation5]   ;;  %s246_s25 = smov 128  }
   0x6   :  { %s29_s24 = sshll.u32 %s245_s23, 4  ;;  %s247_s26 = smov 8   ;;  %s30_s24 = int_to_ptr.vmem [resolvable:$true] %s29_s24 }
   0x7   :  { %35 = dma.hbm_to_vmem [thread:$0]  %s28_s22, 2048, %s30_s24, [#allocation6], %s246_s25, %s246_s25, %s247_s26  }
   0x8   :  { %238 = dma.done.wait [#allocation3], 128  }
   0x9   :  { %239 = vsyncadd [#allocation3], 4294967168 }
   0xa   :  { %240 = dma.done.wait [#allocation6], 2048  }
   0xb   :  { %241 = vsyncadd [#allocation6], 4294965248  ;;  %v70_v0 = vld [vmem:[#allocation5 + $0x78] sm:$0xff]  ;;  %v69_v1 = vld [vmem:[#allocation5 + $0x70] sm:$0xff]  ;;  %s248_s29 = smov [#allocation7]   ;;  %s146_s7 = sshll.u32 %s293_s4, 4  ;;  %s147_s7 = int_to_ptr.hbm [resolvable:$true] %s146_s7 }
   0xc   :  { %71 = vmatpush.msra.mxu0 %v70_v0  ;;  %v68_v2 = vld [vmem:[#allocation5 + $0x68] sm:$0xff]  ;;  %v67_v3 = vld [vmem:[#allocation5 + $0x60] sm:$0xff]  ;;  %v66_v4 = vld [vmem:[#allocation5 + $0x58] sm:$0xff]  ;;  %s144_s30 = sshll.u32 %s248_s29, 4  ;;  %s145_s30 = int_to_ptr.vmem [resolvable:$true] %s144_s30 }
   0xd   :  { %v65_v5 = vld [vmem:[#allocation5 + $0x50] sm:$0xff]  ;;  %v64_v6 = vld [vmem:[#allocation5 + $0x48] sm:$0xff]  ;;  %v63_v7 = vld [vmem:[#allocation5 + $0x40] sm:$0xff] }
   0xe   :  { %72 = vmatpush.msra.mxu0 %v69_v1  ;;  %v62_v8 = vld [vmem:[#allocation5 + $0x38] sm:$0xff]  ;;  %v61_v9 = vld [vmem:[#allocation5 + $0x30] sm:$0xff]  ;;  %v60_v10 = vld [vmem:[#allocation5 + $0x28] sm:$0xff] }
   0xf   :  { %v59_v11 = vld [vmem:[#allocation5 + $0x20] sm:$0xff]  ;;  %v58_v12 = vld [vmem:[#allocation5 + $0x18] sm:$0xff]  ;;  %v57_v13 = vld [vmem:[#allocation5 + $0x10] sm:$0xff] }
  0x10   :  { %73 = vmatpush.msra.mxu0 %v68_v2  ;;  %v56_v14 = vld [vmem:[#allocation5 + $0x8] sm:$0xff]  ;;  %v55_v15 = vld [vmem:[#allocation5] sm:$0xff]  ;;  %v54_v16 = vld [vmem:[#allocation2] sm:$0xff] }
  0x11   :  { %v113_v40 = vld [vmem:[%s291_s2] sm:$0x1] }
  0x12   :  { %74 = vmatpush.msra.mxu0 %v67_v3  ;;  %v163_v45 = vld [vmem:[%s292_s3] ss:$0 sm:$0xff] }
  0x14   :  { %75 = vmatpush.msra.mxu0 %v66_v4 }
  0x16   :  { %76 = vmatpush.msra.mxu0 %v65_v5 }
  0x18   :  { %77 = vmatpush.msra.mxu0 %v64_v6 }
  0x1a   :  { %78 = vmatpush.msra.mxu0 %v63_v7 }
  0x1c   :  { %79 = vmatpush.msra.mxu0 %v62_v8 }
  0x1e   :  { %80 = vmatpush.msra.mxu0 %v61_v9 }
  0x20   :  { %81 = vmatpush.msra.mxu0 %v60_v10 }
  0x22   :  { %82 = vmatpush.msra.mxu0 %v59_v11 }
  0x24   :  { %83 = vmatpush.msra.mxu0 %v58_v12 }
  0x26   :  { %84 = vmatpush.msra.mxu0 %v57_v13 }
  0x28   :  { %85 = vmatpush.msra.mxu0 %v56_v14 }
  0x2a   :  { %86 = vmatpush.msra.mxu0 %v55_v15 }
  0x2b   :  { %87 = vmatmul.f32.vlgmr.msra.gmra.mxu0 %v54_v16 }
  0xa8   :  { %v88_v17 = vpop.f32.mrf.mxu0 }
  0xa9   :  { %v97_v18 = vrot.slane %v88_v17, 4 }
  0xab   :  { %v98_v19 = vadd.f32 %v97_v18, %v88_v17 }
  0xad   :  { %v99_v20 = vrot.slane %v98_v19, 2 }
  0xaf   :  { %v100_v21 = vadd.f32 %v99_v20, %v98_v19 }
  0xb1   :  { %v101_v22 = vrot.slane %v100_v21, 1 }
  0xb3   :  { %v102_v23 = vadd.f32 %v101_v22, %v100_v21 }
  0xb5   :  { %v103_v24 = vmul.f32 0.125, %v102_v23 }
  0xb7   :  { %v104_v25 = vsub.f32 %v88_v17, %v103_v24 }
  0xb9   :  { %v105_v26 = vmul.f32 %v104_v25, %v104_v25 }
  0xbb   :  { %v106_v27 = vrot.slane %v105_v26, 4 }
  0xbd   :  { %v107_v28 = vadd.f32 %v106_v27, %v105_v26 }
  0xbf   :  { %v108_v29 = vrot.slane %v107_v28, 2 }
  0xc1   :  { %v109_v30 = vadd.f32 %v108_v29, %v107_v28 }
  0xc3   :  { %v110_v31 = vrot.slane %v109_v30, 1 }
  0xc5   :  { %v111_v32 = vadd.f32 %v110_v31, %v109_v30 }
  0xc7   :  { %v112_v33 = vmul.f32 0.125, %v111_v32 }
  0xc9   :  { %v114_v34 = vadd.f32 1e-05, %v112_v33 }
  0xcb   :  { %164 = vrsqrt.f32 %v114_v34  ;;  %vm121_vm1 = vweird.f32 %v114_v34 }
  0xd1   :  { %v165_v35 = vpop.eup %164 }
  0xd2   :  { %v116_v36 = vmul.f32 %v165_v35, %v114_v34  ;;  %vm122_vm0 = vweird.f32 %v165_v35 }
  0xd3   :  { %vm123_vm2 = vmor %vm121_vm1, %vm122_vm0 }
  0xd4   :  { %v117_v37 = vmul.f32 %v165_v35, %v116_v36 }
  0xd6   :  { %v118_v38 = vmul.f32 0.5, %v117_v37 }
  0xd8   :  { %v119_v39 = vsub.f32 1.5, %v118_v38 }
  0xda   :  { %v120_v41 = vmul.f32 %v165_v35, %v119_v39 }
  0xdc   :  { %v124_v42 = vsel %vm123_vm2, %v165_v35, %v120_v41 }
  0xdd   :  { %v125_v43 = vmul.f32 %v124_v42, %v113_v40 }
  0xdf   :  { %v127_v44 = vperm.slane %v125_v43, 0 }
  0xe1   :  { %v129_v46 = vmul.f32 %v127_v44, %v104_v25 }
  0xe3   :  { %v134_v47 = vadd.f32 %v163_v45, %v129_v46 }
  0xe5   :  { %vm135_vm3 = vcmp.ge.f32.partialorder %v134_v47, 0.0  ;;  %v136_v48 = vmul.f32 0.01, %v134_v47 }
  0xe7   :  { %v137_v49 = vsel %vm135_vm3, %v134_v47, %v136_v48 }
  0xe8   :  { %138 = vst [vmem:[#allocation7] sm:$0xff] %v137_v49 }
  0xe9   :  { %149 = dma.vmem_to_hbm [thread:$0]  %s145_s30, 128, %s147_s7, [#allocation4]  }
  0xea   :  { %242 = dma.done.wait [#allocation4], 128  }
  0xeb   :  { %243 = vsyncadd [#allocation4], 4294967168 }
  0xec   :  { %154 = vsyncpa [#allocation3], 1 }
  0xed   :  { %155 = vsyncpa [#allocation6], 1 }
  0xee   :  { %156 = vsyncpa [#allocation4], 1 }

</bundles_post_ra>
